<compile_context>
chip_gen: v6e
topology: v6e:2x2x1
jax: 0.10.0
libtpu: 0.0.40
codegen_flags: <defaults>
</compile_context>

<pallas_src>
import functools

import jax
import jax.numpy as jnp
from jax import lax
from jax.experimental import pallas as pl
from jax.experimental.pallas import tpu as pltpu


def _round_up(n, m):
    return ((n + m - 1) // m) * m


# ----------------------------------------------------------------------------
# Host-side helper: bake the circular-DOA conv + KH time taps into ONE matrix
# ----------------------------------------------------------------------------
def _build_doa_fused_weight(w_oihw, D, in_lanes, out_lanes):
    """(Cout, Cin, KH, KW) OIHW conv weight -> (KH*in_lanes, out_lanes) matmul weight.

    Row layout   : kh * in_lanes + (d_src * Cin + c)   (rows >= D*Cin per tap are zero)
    Column layout: d_out * Cout + o                    (cols >= D*Cout are zero)
    so that  y[row, d*Cout+o] = LHS[row, :] @ W  reproduces a 'same' conv that is
    zero-padded along time (handled by the canvas rows) and circular along DOA.
    """
    Cout, Cin, KH, KW = w_oihw.shape
    pw = KW // 2
    d = jnp.arange(D)
    taps = jnp.transpose(w_oihw, (2, 3, 1, 0)).astype(jnp.float32)   # (KH, KW, Cin, Cout)
    W = jnp.zeros((KH, D, Cin, D, Cout), jnp.float32)
    for kw in range(KW):
        src = (d + kw - pw) % D                                      # source DOA per output DOA
        onehot = (jnp.arange(D)[:, None] == src[None, :]).astype(jnp.float32)  # (D_src, D_out)
        W = W + onehot[None, :, None, :, None] * taps[:, kw][:, None, :, None, :]
    W = W.reshape(KH, D * Cin, D * Cout)
    W = jnp.pad(W, ((0, 0), (0, in_lanes - D * Cin), (0, out_lanes - D * Cout)))
    return W.reshape(KH * in_lanes, out_lanes)


# ----------------------------------------------------------------------------
# Fused Pallas kernel: all conv layers + activations, a batch block per step
# ----------------------------------------------------------------------------
def _fused_branch_kernel(*refs, T, Tpad, PH, layer_meta, output_act, compute_dtype):
    """refs = (x_ref, w0_ref, b0_ref, w1_ref, b1_ref, ..., o_ref).

    x_ref : (BBLK*Tpad, in_lanes0) f32 canvas, valid rows at [PH, PH+T) per batch item,
            zero rows elsewhere, lane-major DOA*channel layout (zero-padded lanes).
    wL_ref: (KH_L*in_lanes_L, out_lanes_L) bf16, circular DOA + time taps baked in.
    bL_ref: (1, out_lanes_L) f32 bias (tiled over DOA, zero on pad lanes).
    o_ref : (BBLK*Tpad, out_lanes_last) f32 (lane-dense, valid rows sliced by wrapper).
    layer_meta: tuple of (KH, ph) per layer.
    """
    o_ref = refs[-1]
    x_ref = refs[0]
    n_layers = len(layer_meta)
    rows = x_ref.shape[0]

    # Row mask: sublane index within each per-batch canvas must be in [PH, PH+T).
    s = lax.broadcasted_iota(jnp.int32, (rows, 1), 0) % Tpad
    valid = jnp.logical_and(s >= PH, s < PH + T)

    cur = x_ref[...]                                   # (rows, in_lanes0) f32

    for li, (kh_taps, ph) in enumerate(layer_meta):
        w_ref = refs[1 + 2 * li]
        b_ref = refs[2 + 2 * li]

        # im2col along the lane axis: KH sublane rolls (XLU slot) + 128-aligned concat.
        # Tap kh at output row r reads canvas row r + kh - ph; wrap rows only land in
        # pad rows which are masked out / sliced off later.
        if kh_taps == 1:
            lhs = cur
        else:
            taps = []
            for kh in range(kh_taps):
                shift = (ph - kh) % rows
                taps.append(cur if shift == 0 else pltpu.roll(cur, shift=shift, axis=0))
            lhs = jnp.concatenate(taps, axis=-1)        # (rows, KH*in_lanes) f32

        # One fused MXU matmul per layer (K = KH*in_lanes), f32 accumulation.
        y = jnp.dot(lhs.astype(compute_dtype), w_ref[...],
                    preferred_element_type=jnp.float32)
        y = y + b_ref[...]                              # (rows, out_lanes) f32

        last = li == n_layers - 1
        act = output_act if last else "relu"
        if act == "relu":
            y = jnp.maximum(y, 0.0)
        elif act == "sigmoid":
            y = jax.nn.sigmoid(y)
        elif act != "none":
            raise ValueError(f"unknown activation {act!r}")

        if last:
            o_ref[...] = y.astype(o_ref.dtype)          # lane-dense unmasked store
        else:
            # Zero the time-pad rows so the next layer's taps read correct zeros.
            # Pure VPU select; the hidden activation never leaves vregs/VMEM and no
            # concat / misaligned slice is materialized.
            cur = jnp.where(valid, y, 0.0)


# ----------------------------------------------------------------------------
# _FrameWiseBranch forward
# ----------------------------------------------------------------------------
def frame_wise_branch_forward(x_nchw, params, output_act="sigmoid",
                              compute_dtype=jnp.bfloat16, num_batch_blocks=1):
    """x_nchw: (B, C, T, D) as in PyTorch.  Returns (B, Cout_last, T, D).

    num_batch_blocks: grid size; 1 (default) = whole batch in one step (v5e/v6e),
    2 = split batch across v7x's two TensorCores when B is even.
    """
    B, Cin, T, D = x_nchw.shape
    assert B % num_batch_blocks == 0, "B must divide num_batch_blocks"
    BBLK = B // num_batch_blocks

    phs = [w.shape[2] // 2 for (w, _) in params]
    PH = max(phs)
    Tpad = _round_up(2 * PH + T, 8)                     # canvas rows per batch item

    # --- single entry transform: NCHW -> zero-padded, lane-major canvas ------------
    # TODO(synk): fold this transpose/pad into the kernel for long sequences.
    in_lanes0 = _round_up(D * Cin, 128)
    x = jnp.transpose(x_nchw, (0, 2, 3, 1)).reshape(B, T, D * Cin)
    x = jnp.pad(x, ((0, 0), (PH, Tpad - PH - T), (0, in_lanes0 - D * Cin)))
    x2d = x.reshape(B * Tpad, in_lanes0).astype(jnp.float32)

    inputs = [x2d]
    in_specs = [pl.BlockSpec((BBLK * Tpad, in_lanes0), lambda g: (g, 0))]
    layer_meta = []
    flops = 0
    in_lanes = in_lanes0
    cin_l = Cin
    rows_total = B * Tpad
    for w, bias in params:
        cout_l, cin_chk, KH, KW = w.shape
        assert cin_chk == cin_l, "channel mismatch in conv stack"
        out_lanes = _round_up(D * cout_l, 128)
        Wf = _build_doa_fused_weight(w, D, in_lanes, out_lanes).astype(compute_dtype)
        bt = jnp.pad(jnp.tile(bias.astype(jnp.float32), D),
                     (0, out_lanes - D * cout_l)).reshape(1, out_lanes)
        inputs += [Wf, bt]
        in_specs += [pl.BlockSpec(Wf.shape, lambda g: (0, 0)),   # VMEM-resident
                     pl.BlockSpec(bt.shape, lambda g: (0, 0))]   # VMEM-resident
        layer_meta.append((KH, KH // 2))
        flops += 2 * rows_total * Wf.shape[0] * Wf.shape[1]
        in_lanes = out_lanes
        cin_l = cout_l
    cout_last = cin_l
    out_lanes_last = in_lanes

    # Scheduling hints: cost estimate + explicit VMEM budget (review items).
    weight_bytes = sum(int(a.size) * a.dtype.itemsize for a in inputs[1:])
    io_bytes = BBLK * Tpad * (in_lanes0 + out_lanes_last) * 4
    max_k = max(w.shape[0] for w in inputs[1::2])
    scratch_est = 6 * BBLK * Tpad * max_k * 4           # rolled taps + lhs + y (f32)
    vmem_limit = min(int(2 * (weight_bytes + io_bytes) + scratch_est + (2 << 20)),
                     96 << 20)
    transcendentals = rows_total * out_lanes_last if output_act == "sigmoid" else 0
    bytes_accessed = (int(x2d.size) * x2d.dtype.itemsize + weight_bytes
                      + rows_total * out_lanes_last * 4)

    out = pl.pallas_call(
        functools.partial(_fused_branch_kernel, T=T, Tpad=Tpad, PH=PH,
                          layer_meta=tuple(layer_meta), output_act=output_act,
                          compute_dtype=compute_dtype),
        out_shape=jax.ShapeDtypeStruct((B * Tpad, out_lanes_last), jnp.float32),
        grid=(num_batch_blocks,),
        in_specs=in_specs,
        out_specs=pl.BlockSpec((BBLK * Tpad, out_lanes_last), lambda g: (g, 0)),
        compiler_params=pltpu.CompilerParams(
            dimension_semantics=("parallel",),
            vmem_limit_bytes=vmem_limit),
        cost_estimate=pl.CostEstimate(flops=int(flops),
                                      transcendentals=int(transcendentals),
                                      bytes_accessed=int(bytes_accessed)),
    )(*inputs)

    # --- single exit transform ------------------------------------------------------
    out = out.reshape(B, Tpad, out_lanes_last)[:, PH:PH + T, :D * cout_last]
    out = out.reshape(B, T, D, cout_last)
    return jnp.transpose(out, (0, 3, 1, 2)).astype(x_nchw.dtype)


# ----------------------------------------------------------------------------
# Pure-JAX reference (lax.conv, f32 HIGHEST) for verification
# ----------------------------------------------------------------------------
def _circular_pad_nhwc(x, ph, pw):
    x = jnp.pad(x, ((0, 0), (ph, ph), (0, 0), (0, 0)))                # time: zeros
    x = jnp.pad(x, ((0, 0), (0, 0), (pw, pw), (0, 0)), mode="wrap")   # doa: circular
    return x


def _conv_ref(x_nhwc, w_oihw, b, act):
    Cout, _, KH, KW = w_oihw.shape
    xp = _circular_pad_nhwc(x_nhwc, KH // 2, KW // 2)
    w_hwio = jnp.transpose(w_oihw, (2, 3, 1, 0))
    y = jax.lax.conv_general_dilated(
        xp, w_hwio, window_strides=(1, 1), padding="VALID",
        dimension_numbers=("NHWC", "HWIO", "NHWC"),
        precision=jax.lax.Precision.HIGHEST)
    y = y + b[None, None, None, :]
    if act == "relu":
        y = jnp.maximum(y, 0.0)
    elif act == "sigmoid":
        y = jax.nn.sigmoid(y)
    return y


def frame_wise_branch_ref(x_nchw, params, output_act="sigmoid"):
    x = jnp.transpose(x_nchw, (0, 2, 3, 1))
    n_layers = len(params)
    for li, (w, b) in enumerate(params):
        act = output_act if li == n_layers - 1 else "relu"
        x = _conv_ref(x, w, b, act)
    return jnp.transpose(x, (0, 3, 1, 2))


# ----------------------------------------------------------------------------
if __name__ == "__main__":
    key = jax.random.PRNGKey(0)

    # Small shapes: batch=2, channels=4, time frames=16, DOA bins=16
    B, Cin, T, D = 2, 4, 16, 16
    hidden, Cout = 16, 1
    KH = KW = 3

    k_x, k_w1, k_b1, k_w2, k_b2 = jax.random.split(key, 5)
    x = jax.random.normal(k_x, (B, Cin, T, D), dtype=jnp.float32)

    # Deterministic synthetic parameters (PyTorch conv weight layout OIHW).
    params = [
        (0.1 * jax.random.normal(k_w1, (hidden, Cin, KH, KW), dtype=jnp.float32),
         0.1 * jax.random.normal(k_b1, (hidden,), dtype=jnp.float32)),
        (0.1 * jax.random.normal(k_w2, (Cout, hidden, KH, KW), dtype=jnp.float32),
         0.1 * jax.random.normal(k_b2, (Cout,), dtype=jnp.float32)),
    ]

    out = frame_wise_branch_forward(x, params, output_act="sigmoid")
    out = jax.block_until_ready(out)
    assert out.shape == (B, Cout, T, D), out.shape

    ref = jax.block_until_ready(frame_wise_branch_ref(x, params, output_act="sigmoid"))
    # Intended precision: bf16 MXU operands with f32 accumulation / epilogue; the
    # reference is f32 HIGHEST, hence the 1e-2 tolerance.
    assert jnp.allclose(out, ref, atol=1e-2, rtol=1e-2), "mismatch vs reference"

    print("KERNEL_OK")
</pallas_src>

<mosaic_0001>
module attributes {stable_mosaic.version = 11 : i64} {
  func.func @_fused_branch_kernel(%arg0: i32, %arg1: memref<48x128xf32, #tpu.memory_space<vmem>>, %arg2: memref<384x256xbf16, #tpu.memory_space<vmem>>, %arg3: memref<1x256xf32, #tpu.memory_space<vmem>>, %arg4: memref<768x128xbf16, #tpu.memory_space<vmem>>, %arg5: memref<1x128xf32, #tpu.memory_space<vmem>>, %arg6: memref<48x128xf32, #tpu.memory_space<vmem>>) attributes {dimension_semantics = [#tpu.dimension_semantics<parallel>], iteration_bounds = array<i64: 1>, scalar_prefetch = 0 : i64, scratch_operands = 0 : i64, tpu.core_type = #tpu.core_type<tc>, window_params = [{transform_indices = @transform_0, window_bounds = array<i64: 48, 128>}, {pipeline_mode = #tpu.pipeline_mode<synchronous>, transform_indices = @transform_1, window_bounds = array<i64: 384, 256>}, {pipeline_mode = #tpu.pipeline_mode<synchronous>, transform_indices = @transform_2, window_bounds = array<i64: 1, 256>}, {pipeline_mode = #tpu.pipeline_mode<synchronous>, transform_indices = @transform_3, window_bounds = array<i64: 768, 128>}, {pipeline_mode = #tpu.pipeline_mode<synchronous>, transform_indices = @transform_4, window_bounds = array<i64: 1, 128>}, {transform_indices = @transform_5, window_bounds = array<i64: 48, 128>}]} {
    %0 = tpu.iota {dimensions = array<i32: 0>} : vector<48x1xi32>
    %c24_i32 = arith.constant 24 : i32
    %c0_i32 = arith.constant 0 : i32
    %1 = arith.cmpi eq, %c24_i32, %c0_i32 : i32
    %c1_i32 = arith.constant 1 : i32
    %2 = arith.select %1, %c1_i32, %c24_i32 : i32
    %3 = vector.broadcast %2 : i32 to vector<48x1xi32>
    %4 = arith.remsi %0, %3 : vector<48x1xi32>
    %c0_i32_0 = arith.constant 0 : i32
    %5 = vector.broadcast %c0_i32_0 : i32 to vector<48x1xi32>
    %6 = arith.cmpi ne, %4, %5 : vector<48x1xi32>
    %c0_i32_1 = arith.constant 0 : i32
    %7 = vector.broadcast %c0_i32_1 : i32 to vector<48x1xi32>
    %8 = arith.cmpi slt, %4, %7 : vector<48x1xi32>
    %c0_i32_2 = arith.constant 0 : i32
    %9 = arith.cmpi slt, %2, %c0_i32_2 : i32
    %10 = vector.broadcast %9 : i1 to vector<48x1xi1>
    %11 = vector.broadcast %10 : vector<48x1xi1> to vector<48x1xi1>
    %12 = arith.xori %8, %11 : vector<48x1xi1>
    %13 = arith.andi %12, %6 : vector<48x1xi1>
    %14 = vector.broadcast %2 : i32 to vector<48x1xi32>
    %15 = arith.addi %4, %14 : vector<48x1xi32>
    %16 = arith.select %13, %15, %4 : vector<48x1xi1>, vector<48x1xi32>
    %c1_i32_3 = arith.constant 1 : i32
    %17 = vector.broadcast %c1_i32_3 : i32 to vector<48x1xi32>
    %18 = arith.cmpi sge, %16, %17 : vector<48x1xi32>
    %c17_i32 = arith.constant 17 : i32
    %19 = vector.broadcast %c17_i32 : i32 to vector<48x1xi32>
    %20 = arith.cmpi slt, %16, %19 : vector<48x1xi32>
    %21 = arith.andi %18, %20 : vector<48x1xi1>
    %c0 = arith.constant 0 : index
    %c0_4 = arith.constant 0 : index
    %22 = vector.load %arg1[%c0, %c0_4] : memref<48x128xf32, #tpu.memory_space<vmem>>, vector<48x128xf32>
    %c1_i32_5 = arith.constant 1 : i32
    %23 = tpu.dynamic_rotate %22 by %c1_i32_5 dim 0 : vector<48x128xf32>, i32 -> vector<48x128xf32>
    %c47_i32 = arith.constant 47 : i32
    %24 = tpu.dynamic_rotate %22 by %c47_i32 dim 0 : vector<48x128xf32>, i32 -> vector<48x128xf32>
    %25 = tpu.concatenate %23, %22, %24 in 1 : vector<48x128xf32>, vector<48x128xf32>, vector<48x128xf32> -> vector<48x384xf32>
    %26 = arith.truncf %25 : vector<48x384xf32> to vector<48x384xbf16>
    %c0_6 = arith.constant 0 : index
    %c0_7 = arith.constant 0 : index
    %27 = vector.load %arg2[%c0_6, %c0_7] : memref<384x256xbf16, #tpu.memory_space<vmem>>, vector<384x256xbf16>
    %cst = arith.constant dense<0.000000e+00> : vector<48x256xf32>
    %28 = tpu.matmul %26, %27, %cst {dimension_numbers = #tpu.dot_dimension_numbers<[1], [0], [0], [1], [0, 0, 1, 1], [], []>} : vector<48x384xbf16>, vector<384x256xbf16>, vector<48x256xf32> -> vector<48x256xf32>
    %c0_8 = arith.constant 0 : index
    %c0_9 = arith.constant 0 : index
    %29 = vector.load %arg3[%c0_8, %c0_9] : memref<1x256xf32, #tpu.memory_space<vmem>>, vector<1x256xf32>
    %30 = vector.broadcast %29 : vector<1x256xf32> to vector<48x256xf32>
    %31 = arith.addf %28, %30 : vector<48x256xf32>
    %cst_10 = arith.constant 0.000000e+00 : f32
    %32 = vector.broadcast %cst_10 : f32 to vector<48x256xf32>
    %33 = arith.maximumf %31, %32 : vector<48x256xf32>
    %cst_11 = arith.constant 0.000000e+00 : f32
    %34 = vector.shape_cast %21 : vector<48x1xi1> to vector<48x1xi1>
    %35 = vector.broadcast %34 : vector<48x1xi1> to vector<48x256xi1>
    %36 = vector.broadcast %cst_11 : f32 to vector<48x256xf32>
    %37 = arith.select %35, %33, %36 : vector<48x256xi1>, vector<48x256xf32>
    %c1_i32_12 = arith.constant 1 : i32
    %38 = tpu.dynamic_rotate %37 by %c1_i32_12 dim 0 : vector<48x256xf32>, i32 -> vector<48x256xf32>
    %c47_i32_13 = arith.constant 47 : i32
    %39 = tpu.dynamic_rotate %37 by %c47_i32_13 dim 0 : vector<48x256xf32>, i32 -> vector<48x256xf32>
    %40 = tpu.concatenate %38, %37, %39 in 1 : vector<48x256xf32>, vector<48x256xf32>, vector<48x256xf32> -> vector<48x768xf32>
    %41 = arith.truncf %40 : vector<48x768xf32> to vector<48x768xbf16>
    %c0_14 = arith.constant 0 : index
    %c0_15 = arith.constant 0 : index
    %42 = vector.load %arg4[%c0_14, %c0_15] : memref<768x128xbf16, #tpu.memory_space<vmem>>, vector<768x128xbf16>
    %cst_16 = arith.constant dense<0.000000e+00> : vector<48x128xf32>
    %43 = tpu.matmul %41, %42, %cst_16 {dimension_numbers = #tpu.dot_dimension_numbers<[1], [0], [0], [1], [0, 0, 1, 1], [], []>} : vector<48x768xbf16>, vector<768x128xbf16>, vector<48x128xf32> -> vector<48x128xf32>
    %c0_17 = arith.constant 0 : index
    %c0_18 = arith.constant 0 : index
    %44 = vector.load %arg5[%c0_17, %c0_18] : memref<1x128xf32, #tpu.memory_space<vmem>>, vector<1x128xf32>
    %45 = vector.broadcast %44 : vector<1x128xf32> to vector<48x128xf32>
    %46 = arith.addf %43, %45 : vector<48x128xf32>
    %47 = arith.negf %46 : vector<48x128xf32>
    %48 = math.exp %47 : vector<48x128xf32>
    %cst_19 = arith.constant 1.000000e+00 : f32
    %49 = vector.broadcast %cst_19 : f32 to vector<48x128xf32>
    %50 = arith.addf %49, %48 : vector<48x128xf32>
    %51 = arith.divf %49, %50 : vector<48x128xf32>
    %c0_20 = arith.constant 0 : index
    %c0_21 = arith.constant 0 : index
    %52 = vector.load %arg6[%c0_20, %c0_21] : memref<48x128xf32, #tpu.memory_space<vmem>>, vector<48x128xf32>
    tpu.vector_store %arg6[%c0_20, %c0_21], %51 {strides = array<i32>} : memref<48x128xf32, #tpu.memory_space<vmem>>, vector<48x128xf32>,
    return
  }
  func.func @transform_0(%arg0: i32) -> (i32, i32) {
    %c0_i32 = arith.constant 0 : i32
    %c0_i32_0 = arith.constant 0 : i32
    return %arg0, %c0_i32 : i32, i32
  }
  func.func @transform_1(%arg0: i32) -> (i32, i32) {
    %c0_i32 = arith.constant 0 : i32
    %c0_i32_0 = arith.constant 0 : i32
    %c0_i32_1 = arith.constant 0 : i32
    return %c0_i32, %c0_i32_0 : i32, i32
  }
  func.func @transform_2(%arg0: i32) -> (i32, i32) {
    %c0_i32 = arith.constant 0 : i32
    %c0_i32_0 = arith.constant 0 : i32
    %c0_i32_1 = arith.constant 0 : i32
    return %c0_i32, %c0_i32_0 : i32, i32
  }
  func.func @transform_3(%arg0: i32) -> (i32, i32) {
    %c0_i32 = arith.constant 0 : i32
    %c0_i32_0 = arith.constant 0 : i32
    %c0_i32_1 = arith.constant 0 : i32
    return %c0_i32, %c0_i32_0 : i32, i32
  }
  func.func @transform_4(%arg0: i32) -> (i32, i32) {
    %c0_i32 = arith.constant 0 : i32
    %c0_i32_0 = arith.constant 0 : i32
    %c0_i32_1 = arith.constant 0 : i32
    return %c0_i32, %c0_i32_0 : i32, i32
  }
  func.func @transform_5(%arg0: i32) -> (i32, i32) {
    %c0_i32 = arith.constant 0 : i32
    %c0_i32_0 = arith.constant 0 : i32
    return %arg0, %c0_i32 : i32, i32
  }
}

</mosaic_0001>

<bundles_post_ra>
// kernel: tpu_custom_call.1
= control target key start
LH: loop header
LB: loop body
LE: loop exit
PB: predicated region body
PF: predicated region fallthrough
CT: control target
= control target key end

     0   :  { %10 = vsyncpa [#allocation3], 0  ;;  %s2247_s0 = inlined_call_operand.hbm [shape: f32[48,128], index: 0, kind: input, shape index: {}]   ;;  %s2248_s1 = inlined_call_operand.hbm [shape: bf16[384,256], index: 1, kind: input, shape index: {}]   ;;  %s2249_s2 = inlined_call_operand.vmem [shape: f32[1,256], index: 2, kind: input, shape index: {}]   ;;  %s2250_s3 = inlined_call_operand.hbm [shape: bf16[768,128], index: 3, kind: input, shape index: {}]   ;;  %s2251_s4 = inlined_call_operand.vmem [shape: f32[1,128], index: 4, kind: input, shape index: {}]   ;;  %s2252_s5 = inlined_call_operand.hbm [shape: f32[48,128], index: 5, kind: output, shape index: {}]  }
   0x1   :  { %11 = vsyncpa [#allocation6], 0 }
   0x2   :  { %12 = vsyncpa [#allocation4], 0  ;;  %s1849_s18 = smov [#allocation5]   ;;  %s1850_s20 = smov [#allocation2]  }
   0x3   :  { %s30_s19 = sshll.u32 %s1849_s18, 4  ;;  %s18_s21 = sshll.u32 %s1850_s20, 4  ;;  %s31_s19 = int_to_ptr.vmem [resolvable:$true] %s30_s19  ;;  %s19_s21 = int_to_ptr.vmem [resolvable:$true] %s18_s21 }
   0x4   :  { %s1771_s22 = scalar_lea.vmem %s31_s19, 6144  ;;  %p1776_p1 = scmp.lt.s32.totalorder %s31_s19, %s31_s19 }
   0x5   :  { %p1772_p0 = scmp.ne.s32.totalorder %s31_s19, %s1771_s22  ;;  %p1777_p2 = scmp.lt.s32.totalorder %s1771_s22, %s1771_s22 }
   0x7   :  { %p1778_p3 = por %p1777_p2, %p1776_p1 }
   0x9   :  { %p1779_p4 = pnand %p1778_p3, %p1772_p0 }
   0xb   :  { %1782 = shalt.err (!%p1779_p4)
}
   0xc   :  { %s1851_s23 = smov 128   ;;  %s1852_s24 = smov 8  }
   0xd   :  { %36 = dma.hbm_to_vmem [thread:$0]  %s2248_s1, 6144, %s31_s19, [#allocation6], %s1851_s23, %s1851_s23, %s1852_s24  }
   0xe   :  { %s1791_s27 = scalar_lea.vmem %s19_s21, 768  ;;  %p1796_p6 = scmp.lt.s32.totalorder %s19_s21, %s19_s21 }
   0xf   :  { %p1792_p5 = scmp.ne.s32.totalorder %s19_s21, %s1791_s27  ;;  %p1797_p7 = scmp.lt.s32.totalorder %s1791_s27, %s1791_s27 }
  0x11   :  { %p1798_p8 = por %p1797_p7, %p1796_p6 }
  0x13   :  { %p1799_p9 = pnand %p1798_p8, %p1792_p5 }
  0x15   :  { %1802 = shalt.err (!%p1799_p9)
}
  0x16   :  { %24 = dma.hbm_to_vmem [thread:$0]  %s2247_s0, 768, %s19_s21, [#allocation3], %s1851_s23, %s1851_s23, %s1852_s24  }
  0x17   :  { %s1853_s30 = smov [#allocation7]  }
  0x18   :  { %s44_s6 = sshll.u32 %s1853_s30, 4  ;;  %s45_s6 = int_to_ptr.vmem [resolvable:$true] %s44_s6 }
  0x19   :  { %s1811_s7 = scalar_lea.vmem %s45_s6, 6144  ;;  %p1816_p11 = scmp.lt.s32.totalorder %s45_s6, %s45_s6 }
  0x1a   :  { %p1812_p10 = scmp.ne.s32.totalorder %s45_s6, %s1811_s7  ;;  %p1817_p12 = scmp.lt.s32.totalorder %s1811_s7, %s1811_s7 }
  0x1c   :  { %p1818_p13 = por %p1817_p12, %p1816_p11 }
  0x1e   :  { %p1819_p0 = pnand %p1818_p13, %p1812_p10 }
  0x20   :  { %1822 = shalt.err (!%p1819_p0)
}
  0x21   :  { %s1854_s1 = smov 64   ;;  %s1855_s8 = smov 4  }
  0x22   :  { %50 = dma.hbm_to_vmem [thread:$0]  %s2250_s3, 6144, %s45_s6, [#allocation6], %s1854_s1, %s1854_s1, %s1855_s8  }
  0x23   :  { %1843 = dma.done.wait [#allocation3], 768  }
  0x24   :  { %1844 = vsyncadd [#allocation3], 4294966528 }
  0x25   :  { %1845 = dma.done.wait [#allocation6], 12288  }
  0x26   :  { %1846 = vsyncadd [#allocation6], 4294955008  ;;  %v1856_v0 = vmov 0   ;;  %v1619_v1 = vld [vmem:[#allocation5 + $0x74] ss:$8 sps:$4 sm:$0xff]   ;;  %v63_v28 = vlaneseq  ;;  %v1910_v37 = vld [vmem:[#allocation2 + $0x10] sm:$0xff] }
  0x27   :  { %620 = vmatprep.mubr.bf16.mxu1 %v1856_v0  ;;  %v1621_v2 = vld [vmem:[#allocation5 + $0x70] ss:$8 sps:$4 sm:$0xff]   ;;  %525 = vmatprep.subr.bf16.mxu0 %v1619_v1  ;;  %v1622_v3 = vld [vmem:[#allocation5 + $0x64] ss:$8 sps:$4 sm:$0xff]   ;;  %v1624_v4 = vld [vmem:[#allocation5 + $0x60] ss:$8 sps:$4 sm:$0xff]  }
  0x28   :  { %526 = vmatpush1.bf16.msra.mxu0 %v1621_v2  ;;  %v1625_v5 = vld [vmem:[#allocation5 + $0x54] ss:$8 sps:$4 sm:$0xff]   ;;  %v1627_v6 = vld [vmem:[#allocation5 + $0x50] ss:$8 sps:$4 sm:$0xff]   ;;  %v1628_v7 = vld [vmem:[#allocation5 + $0x44] ss:$8 sps:$4 sm:$0xff]  }
  0x29   :  { %527 = vmatprep.subr.bf16.mxu0 %v1622_v3  ;;  %v1630_v8 = vld [vmem:[#allocation5 + $0x40] ss:$8 sps:$4 sm:$0xff]   ;;  %v1642_v9 = vld [vmem:[#allocation5 + $0x174] ss:$8 sps:$4 sm:$0xff]   ;;  %v1645_v10 = vld [vmem:[#allocation5 + $0x170] ss:$8 sps:$4 sm:$0xff]  }
  0x2a   :  { %v1631_v11 = vld [vmem:[#allocation5 + $0x34] ss:$8 sps:$4 sm:$0xff]   ;;  %588 = vmatprep.subr.bf16.mxu1 %v1642_v9  ;;  %v1648_v12 = vld [vmem:[#allocation5 + $0x164] ss:$8 sps:$4 sm:$0xff]   ;;  %v1651_v13 = vld [vmem:[#allocation5 + $0x160] ss:$8 sps:$4 sm:$0xff]  }
  0x2b   :  { %589 = vmatpush1.bf16.msra.mxu1 %v1645_v10  ;;  %v1633_v14 = vld [vmem:[#allocation5 + $0x30] ss:$8 sps:$4 sm:$0xff]   ;;  %v1634_v15 = vld [vmem:[#allocation5 + $0x24] ss:$8 sps:$4 sm:$0xff]   ;;  %v1654_v16 = vld [vmem:[#allocation5 + $0x154] ss:$8 sps:$4 sm:$0xff]  }
  0x2c   :  { %528 = vmatpush1.bf16.msra.mxu0 %v1624_v4  ;;  %590 = vmatprep.subr.bf16.mxu1 %v1648_v12  ;;  %v1657_v17 = vld [vmem:[#allocation5 + $0x150] ss:$8 sps:$4 sm:$0xff]   ;;  %v1636_v18 = vld [vmem:[#allocation5 + $0x20] ss:$8 sps:$4 sm:$0xff]   ;;  %v1660_v19 = vld [vmem:[#allocation5 + $0x144] ss:$8 sps:$4 sm:$0xff]  }
  0x2d   :  { %529 = vmatprep.subr.bf16.mxu0 %v1625_v5  ;;  %v1637_v20 = vld [vmem:[#allocation5 + $0x14] ss:$8 sps:$4 sm:$0xff]   ;;  %v1639_v21 = vld [vmem:[#allocation5 + $0x10] ss:$8 sps:$4 sm:$0xff]   ;;  %v1663_v22 = vld [vmem:[#allocation5 + $0x140] ss:$8 sps:$4 sm:$0xff]  }
  0x2e   :  { %v1666_v23 = vld [vmem:[#allocation5 + $0x134] ss:$8 sps:$4 sm:$0xff]   ;;  %v1640_v24 = vld [vmem:[#allocation5 + $0x4] ss:$8 sps:$4 sm:$0xff]   ;;  %v1669_v25 = vld [vmem:[#allocation5 + $0x130] ss:$8 sps:$4 sm:$0xff]  }
  0x2f   :  { %591 = vmatpush1.bf16.msra.mxu1 %v1651_v13  ;;  %v1644_v26 = vld [vmem:[#allocation5] ss:$8 sps:$4 sm:$0xff]   ;;  %v1672_v27 = vld [vmem:[#allocation5 + $0x124] ss:$8 sps:$4 sm:$0xff]   ;;  %v1646_v29 = vld [vmem:[#allocation5 + $0xf4] ss:$8 sps:$4 sm:$0xff]  }
  0x30   :  { %530 = vmatpush1.bf16.msra.mxu0 %v1627_v6  ;;  %592 = vmatprep.subr.bf16.mxu1 %v1654_v16  ;;  %v1650_v30 = vld [vmem:[#allocation5 + $0xf0] ss:$8 sps:$4 sm:$0xff]   ;;  %v1675_v31 = vld [vmem:[#allocation5 + $0x120] ss:$8 sps:$4 sm:$0xff]   ;;  %v1678_v32 = vld [vmem:[#allocation5 + $0x114] ss:$8 sps:$4 sm:$0xff]  }
  0x31   :  { %531 = vmatprep.subr.bf16.mxu0 %v1628_v7  ;;  %v1904_v33 = vshrl.u32 %v63_v28, 7  ;;  %v1906_v34 = vld [vmem:[#allocation2] sm:$0xff]  ;;  %v1652_v35 = vld [vmem:[#allocation5 + $0xe4] ss:$8 sps:$4 sm:$0xff]   ;;  %v1908_v36 = vld [vmem:[#allocation2 + $0x8] sm:$0xff]  ;;  %v205_v45 = vrot.slane %v1910_v37, 1 }
  0x32   :  { %v1656_v38 = vld [vmem:[#allocation5 + $0xe0] ss:$8 sps:$4 sm:$0xff]   ;;  %v1681_v39 = vld [vmem:[#allocation5 + $0x110] ss:$8 sps:$4 sm:$0xff]   ;;  %v1684_v40 = vld [vmem:[#allocation5 + $0x104] ss:$8 sps:$4 sm:$0xff]   ;;  %v217_v42 = vpack.c.bf16 %v1908_v36, %v1906_v34 }
  0x33   :  { %593 = vmatpush1.bf16.msra.mxu1 %v1657_v17  ;;  %v203_v41 = vrot.slane %v1906_v34, 1  ;;  %v1658_v43 = vld [vmem:[#allocation5 + $0xd4] ss:$8 sps:$4 sm:$0xff]   ;;  %v204_v44 = vrot.slane %v1908_v36, 1  ;;  %v1919_v47 = vld [vmem:[#allocation2 + $0x18] sm:$0xff]  ;;  %vm209_vm0 = vcmp.lt.s32.totalorder %v1904_v33, 7 }
  0x34   :  { %532 = vmatpush1.bf16.msra.mxu0 %v1630_v8  ;;  %594 = vmatprep.subr.bf16.mxu1 %v1660_v19  ;;  %v1917_v46 = vld [vmem:[#allocation2 + $0x28] sm:$0xff]  ;;  %v1922_v48 = vld [vmem:[#allocation2 + $0x20] sm:$0xff]  ;;  %v1687_v49 = vld [vmem:[#allocation5 + $0x100] ss:$8 sps:$4 sm:$0xff]   ;;  %v190_v50 = vrot.slane %v1906_v34, 7  ;;  %v191_v51 = vrot.slane %v1908_v36, 7 }
  0x35   :  { %533 = vmatprep.subr.bf16.mxu0 %v1631_v11  ;;  %557 = vmatprep.mubr.bf16.mxu0 %v217_v42  ;;  %v1662_v52 = vld [vmem:[#allocation5 + $0xd0] ss:$8 sps:$4 sm:$0xff]   ;;  %v195_v53 = vrot.slane %v1917_v46, 7  ;;  %v206_v54 = vrot.slane %v1919_v47, 1  ;;  %v1664_v55 = vld [vmem:[#allocation5 + $0xc4] ss:$8 sps:$4 sm:$0xff]   ;;  %v213_v56 = vsel %vm209_vm0, %v204_v44, %v205_v45  ;;  %v214_v57 = vsel %vm209_vm0, %v203_v41, %v204_v44 }
  0x36   :  { %v207_v58 = vrot.slane %v1922_v48, 1  ;;  %v192_v59 = vrot.slane %v1910_v37, 7  ;;  %v193_v60 = vrot.slane %v1919_v47, 7  ;;  %v208_v61 = vrot.slane %v1917_v46, 1  ;;  %v1668_v62 = vld [vmem:[#allocation5 + $0xc0] ss:$8 sps:$4 sm:$0xff]  }
  0x37   :  { %595 = vmatpush1.bf16.msra.mxu1 %v1663_v22  ;;  %v218_v63 = vpack.c.bf16 %v213_v56, %v214_v57  ;;  %v1670_v1 = vld [vmem:[#allocation5 + $0xb4] ss:$8 sps:$4 sm:$0xff]   ;;  %v1674_v2 = vld [vmem:[#allocation5 + $0xb0] ss:$8 sps:$4 sm:$0xff]   ;;  %v1676_v3 = vld [vmem:[#allocation5 + $0xa4] ss:$8 sps:$4 sm:$0xff]   ;;  %v212_v5 = vsel %vm209_vm0, %v205_v45, %v206_v54 }
  0x38   :  { %534 = vmatpush1.bf16.msra.mxu0 %v1633_v14  ;;  %596 = vmatprep.subr.bf16.mxu1 %v1666_v23  ;;  %v211_v4 = vsel %vm209_vm0, %v206_v54, %v207_v58  ;;  %vm196_vm1 = vcmp.lt.s32.totalorder %v1904_v33, 1  ;;  %v1680_v6 = vld [vmem:[#allocation5 + $0xa0] ss:$8 sps:$4 sm:$0xff]   ;;  %v1682_v8 = vld [vmem:[#allocation5 + $0x94] ss:$8 sps:$4 sm:$0xff]   ;;  %v210_v11 = vsel %vm209_vm0, %v207_v58, %v208_v61  ;;  %v215_v12 = vsel %vm209_vm0, %v208_v61, %v203_v41 }
  0x39   :  { %535 = vmatprep.subr.bf16.mxu0 %v1634_v15  ;;  %v221_v7 = vpack.c.bf16 %v211_v4, %v212_v5  ;;  %v1686_v9 = vld [vmem:[#allocation5 + $0x90] ss:$8 sps:$4 sm:$0xff]   ;;  %v1688_v10 = vld [vmem:[#allocation5 + $0x84] ss:$8 sps:$4 sm:$0xff]   ;;  %v1690_v13 = vld [vmem:[#allocation5 + $0x80] ss:$8 sps:$4 sm:$0xff]   ;;  %v224_v14 = vpack.c.bf16 %v215_v12, %v210_v11  ;;  %v201_v16 = vsel %vm196_vm1, %v190_v50, %v191_v51  ;;  %v199_v22 = vsel %vm196_vm1, %v192_v59, %v193_v60 }
  0x3a   :  { %v1691_v15 = vld [vmem:[#allocation7 + $0xf8] sm:$0xff]   ;;  %v1693_v19 = vld [vmem:[#allocation7 + $0xf0] sm:$0xff]   ;;  %v200_v23 = vsel %vm196_vm1, %v191_v51, %v192_v59  ;;  %v1696_v28 = vld [vmem:[#allocation7 + $0xa8] sm:$0xff]   ;;  %v69_v11 = vadd.s32 40, %v1904_v33 }
  0x3b   :  { %597 = vmatpush1.bf16.msra.mxu1 %v1669_v25  ;;  %v1692_v17 = vld [vmem:[#allocation7 + $0xb8] sm:$0xff]   ;;  %v219_v25 = vpack.c.bf16 %v199_v22, %v200_v23  ;;  %v1698_v34 = vld [vmem:[#allocation7 + $0xa0] sm:$0xff]   ;;  %v1705_v41 = vld [vmem:[#allocation7 + $0x70] sm:$0xff]  }
  0x3c   :  { %536 = vmatpush1.bf16.msra.mxu0 %v1636_v18  ;;  %598 = vmatprep.subr.bf16.mxu1 %v1672_v27  ;;  %v194_v27 = vrot.slane %v1922_v48, 7  ;;  %v1700_v36 = vld [vmem:[#allocation7 + $0x98] sm:$0xff]   ;;  %v1706_v42 = vld [vmem:[#allocation7 + $0x30] sm:$0xff]   ;;  %v1708_v44 = vld [vmem:[#allocation7 + $0x88] sm:$0xff]  }
  0x3d   :  { %537 = vmatprep.subr.bf16.mxu0 %v1637_v20  ;;  %v220_v20 = vpack.c.bf16 %v1919_v47, %v1910_v37  ;;  %v1701_v37 = vld [vmem:[#allocation7 + $0x78] sm:$0xff]   ;;  %v1709_v45 = vld [vmem:[#allocation7 + $0x68] sm:$0xff]   ;;  %v1711_v47 = vld [vmem:[#allocation7 + $0xc0] sm:$0xff]  }
  0x3e   :  { %v1715_v51 = vld [vmem:[#allocation7 + $0x58] sm:$0xff]   ;;  %v1718_v54 = vld [vmem:[#allocation7 + $0x10] sm:$0xff]   ;;  %v1720_v56 = vld [vmem:[#allocation7 + $0x8] sm:$0xff]  }
  0x3f   :  { %599 = vmatpush1.bf16.msra.mxu1 %v1675_v31  ;;  %v1721_v57 = vld [vmem:[#allocation7 + $0x40] sm:$0xff]   ;;  %v1723_v59 = vld [vmem:[#allocation7 + $0x178] sm:$0xff]  }
  0x40   :  { %538 = vmatpush1.bf16.msra.mxu0 %v1639_v21  ;;  %600 = vmatprep.subr.bf16.mxu1 %v1678_v32  ;;  %v1694_v21 = vld [vmem:[#allocation7 + $0xb0] sm:$0xff]   ;;  %v1697_v32 = vld [vmem:[#allocation7 + $0xe0] sm:$0xff]  }
  0x41   :  { %539 = vmatprep.subr.bf16.mxu0 %v1640_v24  ;;  %v1695_v24 = vld [vmem:[#allocation7 + $0xe8] sm:$0xff]   ;;  %v1722_v58 = vld [vmem:[#allocation7] sm:$0xff]  }
  0x43   :  { %601 = vmatpush1.bf16.msra.mxu1 %v1681_v39  ;;  %v1703_v39 = vld [vmem:[#allocation7 + $0xd0] sm:$0xff]  }
  0x44   :  { %540 = vmatpush1.bf16.msra.mxu0 %v1644_v26  ;;  %602 = vmatprep.subr.bf16.mxu1 %v1684_v40  ;;  %v223_v26 = vpack.c.bf16 %v1917_v46, %v1922_v48  ;;  %v1704_v40 = vld [vmem:[#allocation7 + $0x90] sm:$0xff]   ;;  %v1710_v46 = vld [vmem:[#allocation7 + $0x28] sm:$0xff]   ;;  %v1712_v48 = vld [vmem:[#allocation7 + $0x80] sm:$0xff]  }
  0x45   :  { %541 = vmatprep.subr.bf16.mxu0 %v1646_v29  ;;  %v197_v29 = vsel %vm196_vm1, %v194_v27, %v195_v53 }
  0x47   :  { %603 = vmatpush1.bf16.msra.mxu1 %v1687_v49  ;;  %v1713_v49 = vld [vmem:[#allocation7 + $0x60] sm:$0xff]  }
  0x48   :  { %542 = vmatpush2.bf16.msra.mxu0 %v1650_v30  ;;  %v198_v30 = vsel %vm196_vm1, %v193_v60, %v194_v27  ;;  %1496 = vmatprep.subr.bf16.mxu1 %v1701_v37  ;;  %v65_v60 = vadd.s32 8, %v1904_v33 }
  0x49   :  { %543 = vmatprep.subr.bf16.mxu0 %v1652_v35  ;;  %v222_v31 = vpack.c.bf16 %v197_v29, %v198_v30  ;;  %v1699_v35 = vld [vmem:[#allocation7 + $0xd8] sm:$0xff]  }
  0x4a   :  { %621 = vmatmul.mubr.bf16.vlgmr.msra.gmra.mxu1 %v218_v63 }
  0x4b   :  { %630 = vmatprep.mubr.bf16.mxu1 %v1856_v0 }
  0x4c   :  { %544 = vmatpush2.bf16.msra.mxu0 %v1656_v38  ;;  %v1702_v38 = vld [vmem:[#allocation7 + $0x38] sm:$0xff]  }
  0x4d   :  { %545 = vmatprep.subr.bf16.mxu0 %v1658_v43  ;;  %1497 = vmatpush3.bf16.msra.mxu1 %v1702_v38  ;;  %v1707_v43 = vld [vmem:[#allocation7 + $0xc8] sm:$0xff]  }
  0x4e   :  { %1498 = vmatprep.subr.bf16.mxu1 %v1705_v41 }
  0x50   :  { %546 = vmatpush2.bf16.msra.mxu0 %v1662_v52  ;;  %v1716_v52 = vld [vmem:[#allocation7 + $0x18] sm:$0xff]  }
  0x51   :  { %547 = vmatprep.subr.bf16.mxu0 %v1664_v55  ;;  %1499 = vmatpush3.bf16.msra.mxu1 %v1706_v42  ;;  %v1719_v55 = vld [vmem:[#allocation7 + $0x48] sm:$0xff]  }
  0x52   :  { %631 = vmatmul.mubr.bf16.gmra.mxu1 %v221_v7  ;;  %1500 = vmatprep.subr.bf16.mxu1 %v1709_v45  ;;  %v67_v7 = vadd.s32 24, %v1904_v33 }
  0x53   :  { %640 = vmatprep.mubr.bf16.mxu1 %v1856_v0  ;;  %v202_v0 = vsel %vm196_vm1, %v195_v53, %v190_v50  ;;  %v1714_v50 = vld [vmem:[#allocation7 + $0x20] sm:$0xff]   ;;  %v1717_v53 = vld [vmem:[#allocation7 + $0x50] sm:$0xff]  }
  0x54   :  { %548 = vmatpush2.bf16.msra.mxu0 %v1668_v62  ;;  %v216_v18 = vpack.c.bf16 %v201_v16, %v202_v0  ;;  %v1970_v61 = vmul.u32.u64.low 2863311531, %v1904_v33  ;;  %v1971_v62 = vmul.u32.u64.high 2863311531, %v1904_v33, %v1970_v61  ;;  %v1990_v16 = vadd.s32 32, %v1904_v33 }
  0x55   :  { %549 = vmatprep.subr.bf16.mxu0 %v1670_v1  ;;  %1501 = vmatpush3.bf16.msra.mxu1 %v1710_v46  ;;  %v1973_v63 = vmul.u32.u64.low 2863311531, %v65_v60  ;;  %v1974_v1 = vmul.u32.u64.high 2863311531, %v65_v60, %v1973_v63 }
  0x56   :  { %1502 = vmatprep.subr.bf16.mxu1 %v1713_v49  ;;  %v76_v4 = vshrl.u32 %v1971_v62, 4  ;;  %v1998_v22 = vmul.u32.u64.low 2863311531, %v1990_v16  ;;  %v1999_v23 = vmul.u32.u64.high 2863311531, %v1990_v16, %v1998_v22 }
  0x58   :  { %550 = vmatpush2.bf16.msra.mxu0 %v1674_v2  ;;  %v120_v42 = vshrl.u32 %v1999_v23, 4 }
  0x59   :  { %551 = vmatprep.subr.bf16.mxu0 %v1676_v3  ;;  %1503 = vmatpush3.bf16.msra.mxu1 %v1714_v50  ;;  %v66_v3 = vadd.s32 16, %v1904_v33 }
  0x5a   :  { %641 = vmatmul.mubr.bf16.gmra.mxu1 %v224_v14  ;;  %1504 = vmatprep.subr.bf16.mxu1 %v1715_v51 }
  0x5c   :  { %552 = vmatpush2.bf16.msra.mxu0 %v1680_v6  ;;  %v87_v6 = vshrl.u32 %v1974_v1, 4 }
  0x5d   :  { %553 = vmatprep.subr.bf16.mxu0 %v1682_v8  ;;  %1505 = vmatpush3.bf16.msra.mxu1 %v1716_v52  ;;  %v121_v52 = vmul.u32 24, %v120_v42 }
  0x5e   :  { %1506 = vmatprep.subr.bf16.mxu1 %v1717_v53 }
  0x60   :  { %554 = vmatpush2.bf16.msra.mxu0 %v1686_v9  ;;  %v1982_v8 = vmul.u32.u64.low 2863311531, %v66_v3  ;;  %v1983_v9 = vmul.u32.u64.high 2863311531, %v66_v3, %v1982_v8 }
  0x61   :  { %555 = vmatprep.subr.bf16.mxu0 %v1688_v10  ;;  %1507 = vmatpush3.bf16.msra.mxu1 %v1718_v54  ;;  %v77_v10 = vmul.u32 24, %v76_v4 }
  0x62   :  { %1508 = vmatprep.subr.bf16.mxu1 %v1719_v55 }
  0x63   :  { %v78_v0 = vsub.s32 %v1904_v33, %v77_v10 }
  0x64   :  { %556 = vmatpush2.bf16.msra.mxu0 %v1690_v13  ;;  %v88_v13 = vmul.u32 24, %v87_v6 }
  0x65   :  { %1530 = vmatprep.subr.bf16.mxu0 %v1691_v15  ;;  %1509 = vmatpush3.bf16.msra.mxu1 %v1720_v56  ;;  %v1986_v14 = vmul.u32.u64.low 2863311531, %v67_v7  ;;  %v1987_v15 = vmul.u32.u64.high 2863311531, %v67_v7, %v1986_v14  ;;  %vm136_vm2 = vcmp.ne.s32.totalorder %v78_v0, 0  ;;  %vm142_vm3 = vcmp.lt.s32.totalorder %v78_v0, 0 }
  0x66   :  { %1510 = vmatprep.subr.bf16.mxu1 %v1721_v57  ;;  %v154_v29 = vadd.s32 24, %v78_v0  ;;  %vm148_vm6 = vmand %vm142_vm3, %vm136_vm2 }
  0x67   :  { %558 = vmatmul.mubr.bf16.vlgmr.msra.gmra.mxu0 %v216_v18 }
  0x68   :  { %567 = vmatprep.mubr.bf16.mxu0 %v220_v20  ;;  %1531 = vmatpush3.bf16.msra.mxu0 %v1692_v17  ;;  %v1993_v17 = vmul.u32.u64.low 2863311531, %v69_v11  ;;  %v1994_v18 = vmul.u32.u64.high 2863311531, %v69_v11, %v1993_v17  ;;  %v89_v20 = vsub.s32 %v65_v60, %v88_v13 }
  0x69   :  { %1532 = vmatprep.subr.bf16.mxu0 %v1693_v19  ;;  %1511 = vmatpush3.bf16.msra.mxu1 %v1722_v58 }
  0x6a   :  { %1564 = vmatprep.subr.bf16.mxu1 %v1723_v59  ;;  %vm137_vm4 = vcmp.ne.s32.totalorder %v89_v20, 0  ;;  %vm143_vm5 = vcmp.lt.s32.totalorder %v89_v20, 0 }
  0x6b   :  { %vm149_vm7 = vmand %vm143_vm5, %vm137_vm4 }
  0x6c   :  { %1533 = vmatpush3.bf16.msra.mxu0 %v1694_v21  ;;  %v98_v21 = vshrl.u32 %v1983_v9, 4 }
  0x6d   :  { %1534 = vmatprep.subr.bf16.mxu0 %v1695_v24  ;;  %v281_v24 = vsub.s32 1, %v1904_v33 }
  0x6e   :  { %v99_v30 = vmul.u32 24, %v98_v21 }
  0x6f   :  { %568 = vmatmul.mubr.bf16.gmra.mxu0 %v219_v25  ;;  %v277_v25 = vsub.s32 0, %v1904_v33 }
  0x70   :  { %577 = vmatprep.mubr.bf16.mxu0 %v223_v26  ;;  %1535 = vmatpush3.bf16.msra.mxu0 %v1696_v28  ;;  %v273_v26 = vld [vmem:[%s2249_s2] sm:$0x3]  ;;  %v109_v28 = vshrl.u32 %v1987_v15, 4  ;;  %v100_v41 = vsub.s32 %v66_v3, %v99_v30 }
  0x71   :  { %1536 = vmatprep.subr.bf16.mxu0 %v1697_v32  ;;  %v155_v32 = vadd.s32 24, %v89_v20 }
  0x72   :  { %v110_v38 = vmul.u32 24, %v109_v28  ;;  %vm138_vm11 = vcmp.ne.s32.totalorder %v100_v41, 0  ;;  %vm144_vm12 = vcmp.lt.s32.totalorder %v100_v41, 0  ;;  %v156_v58 = vadd.s32 24, %v100_v41 }
  0x73   :  { %vm150_vm15 = vmand %vm144_vm12, %vm138_vm11 }
  0x74   :  { %1537 = vmatpush3.bf16.msra.mxu0 %v1698_v34  ;;  %v2011_v34 = vrot.slane %v273_v26, %v277_v25  ;;  %v111_v50 = vsub.s32 %v67_v7, %v110_v38  ;;  %v162_v8 = vsel %vm150_vm15, %v156_v58, %v100_v41 }
  0x75   :  { %1538 = vmatprep.subr.bf16.mxu0 %v1699_v35  ;;  %vm168_vm12 = vcmp.ge.s32.totalorder %v162_v8, 1 }
  0x76   :  { %vm139_vm2 = vcmp.ne.s32.totalorder %v111_v50, 0  ;;  %vm145_vm3 = vcmp.lt.s32.totalorder %v111_v50, 0  ;;  %v157_v6 = vadd.s32 24, %v111_v50 }
  0x77   :  { %578 = vmatmul.mubr.bf16.gmra.mxu0 %v222_v31  ;;  %v2009_v31 = vrot.slane %v273_v26, %v281_v24 }
  0x78   :  { %1539 = vmatpush3.bf16.msra.mxu0 %v1700_v36  ;;  %v131_v36 = vshrl.u32 %v1994_v18, 4 }
  0x79   :  { %1540 = vmatprep.subr.bf16.mxu0 %v1703_v39  ;;  %v160_v39 = vsel %vm148_vm6, %v154_v29, %v78_v0  ;;  %vm151_vm6 = vmand %vm145_vm3, %vm139_vm2  ;;  %v1727_v29 = vld [vmem:[#allocation7 + $0x168] sm:$0xff]  }
  0x7a   :  { %vm166_vm8 = vcmp.ge.s32.totalorder %v160_v39, 1  ;;  %vm172_vm9 = vcmp.lt.s32.totalorder %v160_v39, 17  ;;  %v163_v0 = vsel %vm151_vm6, %v157_v6, %v111_v50  ;;  %v1732_v50 = vld [vmem:[#allocation7 + $0x118] sm:$0xff]  }
  0x7b   :  { %vm2025_vm14 = vmand %vm166_vm8, %vm172_vm9  ;;  %vm169_vm2 = vcmp.ge.s32.totalorder %v163_v0, 1  ;;  %vm175_vm3 = vcmp.lt.s32.totalorder %v163_v0, 17 }
  0x7c   :  { %1541 = vmatpush3.bf16.msra.mxu0 %v1704_v40 }
  0x7d   :  { %1542 = vmatprep.subr.bf16.mxu0 %v1707_v43 }
  0x80   :  { %1543 = vmatpush3.bf16.msra.mxu0 %v1708_v44  ;;  %v161_v44 = vsel %vm149_vm7, %v155_v32, %v89_v20 }
  0x81   :  { %1544 = vmatprep.subr.bf16.mxu0 %v1711_v47  ;;  %v132_v47 = vmul.u32 24, %v131_v36  ;;  %vm167_vm10 = vcmp.ge.s32.totalorder %v161_v44, 1  ;;  %vm173_vm13 = vcmp.lt.s32.totalorder %v161_v44, 17 }
  0x82   :  { %vm2035_vm4 = vmand %vm167_vm10, %vm173_vm13  ;;  %vm174_vm13 = vcmp.lt.s32.totalorder %v162_v8, 17 }
  0x83   :  { %v133_v60 = vsub.s32 %v69_v11, %v132_v47  ;;  %vm1472_vm5 = vmpackc.low %vm2035_vm4, %vm2025_vm14 }
  0x84   :  { %1545 = vmatpush3.bf16.msra.mxu0 %v1712_v48  ;;  %vm2079_vm6 = vmand %vm168_vm12, %vm174_vm13 }
  0x85   :  { %vm141_vm7 = vcmp.ne.s32.totalorder %v133_v60, 0  ;;  %vm147_vm8 = vcmp.lt.s32.totalorder %v133_v60, 0  ;;  %v159_v18 = vadd.s32 24, %v133_v60 }
  0x86   :  { %vm153_vm11 = vmand %vm147_vm8, %vm141_vm7 }
  0x87   :  { %v165_v28 = vsel %vm153_vm11, %v159_v18, %v133_v60 }
  0x88   :  { %vm171_vm7 = vcmp.ge.s32.totalorder %v165_v28, 1  ;;  %vm177_vm8 = vcmp.lt.s32.totalorder %v165_v28, 17 }
  0x89   :  { %vm2097_vm11 = vmand %vm171_vm7, %vm177_vm8 }
 0x10a   :  { %v1976_v2 = vpop.f32.mrf.mxu1 }
 0x10c   :  { %v624_v5 = vpop.f32.mrf.mxu1 }
 0x10e   :  { %v626_v12 = vpop.f32.mrf.mxu1 }
 0x110   :  { %v628_v19 = vpop.f32.mrf.mxu1 }
 0x112   :  { %v2006_v27 = vpop.f32.mrf.mxu1 }
 0x114   :  { %v2014_v37 = vpop.f32.mrf.mxu1 }
 0x116   :  { %v636_v49 = vpop.f32.mrf.mxu1 }
 0x118   :  { %v638_v62 = vpop.f32.mrf.mxu1 }
 0x11a   :  { %v642_v13 = vpop.f32.mrf.mxu1 }
 0x11c   :  { %v644_v24 = vpop.f32.mrf.mxu1 }
 0x127   :  { %v559_v35 = vpop.f32.mrf.mxu0 }
 0x128   :  { %v560_v45 = vadd.f32 %v559_v35, %v2011_v34 }
 0x129   :  { %v561_v40 = vpop.f32.mrf.mxu0 }
 0x12a   :  { %v562_v43 = vadd.f32 %v561_v40, %v2009_v31  ;;  %v2030_v57 = vadd.f32 %v1976_v2, %v560_v45  ;;  %v122_v2 = vsub.s32 %v1990_v16, %v121_v52 }
 0x12b   :  { %v563_v46 = vpop.f32.mrf.mxu0 }
 0x12c   :  { %v564_v48 = vadd.f32 %v563_v46, %v2011_v34  ;;  %v2020_v53 = vadd.f32 %v624_v5, %v562_v43  ;;  %v651_v7 = vmax.f32 %v2030_v57, 0.0  ;;  %vm140_vm9 = vcmp.ne.s32.totalorder %v122_v2, 0 }
 0x12d   :  { %v565_v51 = vpop.f32.mrf.mxu0  ;;  %vm146_vm10 = vcmp.lt.s32.totalorder %v122_v2, 0  ;;  %v158_v20 = vadd.s32 24, %v122_v2 }
 0x12e   :  { %v2022_v54 = vadd.f32 %v626_v12, %v564_v48  ;;  %v566_v55 = vadd.f32 %v565_v51, %v2009_v31  ;;  %v652_v4 = vmax.f32 %v2020_v53, 0.0  ;;  %vm152_vm15 = vmand %vm146_vm10, %vm140_vm9  ;;  %v2115_v58 = vsel %vm2025_vm14, %v651_v7, 0.0  ;;  %v1736_v53 = vld [vmem:[#allocation7 + $0x108] sm:$0xff]  }
 0x12f   :  { %v569_v59 = vpop.f32.mrf.mxu0  ;;  %v164_v32 = vsel %vm152_vm15, %v158_v20, %v122_v2  ;;  %v687_v2 = vrot.slane %v2115_v58, 7 }
 0x130   :  { %v2032_v61 = vadd.f32 %v628_v19, %v566_v55  ;;  %v653_v1 = vmax.f32 %v2022_v54, 0.0  ;;  %v570_v15 = vadd.f32 %v569_v59, %v2011_v34  ;;  %vm170_vm10 = vcmp.ge.s32.totalorder %v164_v32, 1 }
 0x131   :  { %v571_v3 = vpop.f32.mrf.mxu0  ;;  %vm176_vm12 = vcmp.lt.s32.totalorder %v164_v32, 17  ;;  %v2121_v59 = vsel %vm2025_vm14, %v652_v4, 0.0 }
 0x132   :  { %v654_v5 = vmax.f32 %v2032_v61, 0.0  ;;  %v572_v11 = vadd.f32 %v571_v3, %v2009_v31  ;;  %v1476_v14 = vpack.c.bf16 %v653_v1, %v651_v7  ;;  %v2077_v25 = vadd.f32 %v2006_v27, %v570_v15  ;;  %v646_v27 = vpop.f32.mrf.mxu1  ;;  %vm2138_vm13 = vmand %vm170_vm10, %vm176_vm12 }
 0x133   :  { %v573_v9 = vpop.f32.mrf.mxu0  ;;  %v2127_v60 = vsel %vm2035_vm4, %v653_v1, 0.0  ;;  %vm1484_vm14 = vmpackc.low %vm2097_vm11, %vm2138_vm13  ;;  %v688_v7 = vrot.slane %v2121_v59, 7 }
 0x134   :  { %v1473_v10 = vpack.c.bf16 %v654_v5, %v652_v4  ;;  %v574_v12 = vadd.f32 %v573_v9, %v2011_v34  ;;  %v635_v22 = vadd.f32 %v2014_v37, %v572_v11  ;;  %v655_v41 = vmax.f32 %v2077_v25, 0.0 }
 0x135   :  { %v575_v16 = vpop.f32.mrf.mxu0  ;;  %v2105_v55 = vsel %vm2035_vm4, %v654_v5, 0.0  ;;  %v689_v4 = vrot.slane %v2127_v60, 7 }
 0x136   :  { %v576_v17 = vadd.f32 %v575_v16, %v2009_v31  ;;  %1474 = vmatprep.mubr.msk.bf16.mxu0 %vm1472_vm5, %v1473_v10  ;;  %v2065_v19 = vadd.f32 %v636_v49, %v574_v12  ;;  %v656_v36 = vmax.f32 %v635_v22, 0.0  ;;  %v648_v49 = vpop.f32.mrf.mxu1  ;;  %v690_v63 = vrot.slane %v2105_v55, 7 }
 0x137   :  { %v579_v21 = vpop.f32.mrf.mxu0  ;;  %1477 = vmatmul.mubr.msk.bf16.vlgmr.msra.gmra.mxu0 %vm1472_vm5, %v1476_v14  ;;  %vm2084_vm5 = vmand %vm169_vm2, %vm175_vm3  ;;  %v707_v16 = vsel %vm196_vm1, %v687_v2, %v689_v4  ;;  %v2174_v18 = vsel %vm2079_vm6, %v655_v41, 0.0 }
 0x138   :  { %v639_v23 = vadd.f32 %v638_v62, %v576_v17  ;;  %v657_v30 = vmax.f32 %v2065_v19, 0.0  ;;  %v580_v42 = vadd.f32 %v579_v21, %v2011_v34  ;;  %vm1478_vm9 = vmpackc.low %vm2084_vm5, %vm2079_vm6  ;;  %v2135_v57 = vsel %vm2079_vm6, %v656_v36, 0.0  ;;  %v1724_v17 = vld [vmem:[#allocation7 + $0x138] sm:$0xff]   ;;  %v1725_v21 = vld [vmem:[#allocation7 + $0x170] sm:$0xff]  }
 0x139   :  { %v581_v26 = vpop.f32.mrf.mxu0  ;;  %v692_v8 = vrot.slane %v2135_v57, 7  ;;  %v691_v25 = vrot.slane %v2174_v18, 7 }
 0x13a   :  { %v658_v38 = vmax.f32 %v639_v23, 0.0  ;;  %v582_v39 = vadd.f32 %v581_v26, %v2009_v31  ;;  %v1482_v45 = vpack.c.bf16 %v657_v30, %v655_v41  ;;  %v2162_v12 = vsel %vm2084_vm5, %v657_v30, 0.0  ;;  %v1726_v26 = vld [vmem:[#allocation7 + $0x130] sm:$0xff]  }
 0x13b   :  { %v583_v35 = vpop.f32.mrf.mxu0  ;;  %v706_v20 = vsel %vm196_vm1, %v690_v63, %v692_v8  ;;  %v693_v22 = vrot.slane %v2162_v12, 7  ;;  %v716_v41 = vrot.slane %v2135_v57, 1  ;;  %v1734_v57 = vld [vmem:[#allocation7 + $0x110] sm:$0xff]  }
 0x13c   :  { %v584_v40 = vadd.f32 %v583_v35, %v2011_v34  ;;  %v1479_v44 = vpack.c.bf16 %v658_v38, %v656_v36  ;;  %v645_v48 = vadd.f32 %v644_v24, %v582_v39  ;;  %v643_v34 = vadd.f32 %v642_v13, %v580_v42  ;;  %v1728_v36 = vld [vmem:[#allocation7 + $0x128] sm:$0xff]   ;;  %v1729_v39 = vld [vmem:[#allocation7 + $0x160] sm:$0xff]  }
 0x13d   :  { %v585_v43 = vpop.f32.mrf.mxu0  ;;  %v708_v13 = vsel %vm196_vm1, %v688_v7, %v690_v63  ;;  %v703_v30 = vsel %vm196_vm1, %v691_v25, %v693_v22  ;;  %v705_v35 = vsel %vm196_vm1, %v689_v4, %v691_v25  ;;  %v713_v63 = vrot.slane %v2127_v60, 1 }
 0x13e   :  { %v647_v46 = vadd.f32 %v646_v27, %v584_v40  ;;  %v586_v47 = vadd.f32 %v585_v43, %v2009_v31  ;;  %1480 = vmatprep.mubr.msk.bf16.mxu0 %vm1478_vm9, %v1479_v44  ;;  %v2109_v31 = vsel %vm2084_vm5, %v658_v38, 0.0  ;;  %v660_v56 = vmax.f32 %v645_v48, 0.0  ;;  %v1730_v43 = vld [vmem:[#allocation7 + $0x120] sm:$0xff]  }
 0x13f   :  { %1483 = vmatmul.mubr.msk.bf16.gmra.mxu0 %vm1478_vm9, %v1482_v45  ;;  %v694_v1 = vrot.slane %v2109_v31, 7  ;;  %v659_v3 = vmax.f32 %v643_v34, 0.0  ;;  %v741_v38 = vpack.c.bf16 %v703_v30, %v705_v35  ;;  %v714_v44 = vrot.slane %v2105_v55, 1  ;;  %v1731_v45 = vld [vmem:[#allocation7 + $0x158] sm:$0xff]  }
 0x140   :  { %v661_v51 = vmax.f32 %v647_v46, 0.0  ;;  %v649_v52 = vadd.f32 %v648_v49, %v586_v47  ;;  %v2181_v23 = vsel %vm2138_vm13, %v660_v56, 0.0  ;;  %v712_v47 = vrot.slane %v2121_v59, 1  ;;  %v1735_v59 = vld [vmem:[#allocation7 + $0x148] sm:$0xff]  }
 0x141   :  { %v704_v15 = vsel %vm196_vm1, %v692_v8, %v694_v1  ;;  %v696_v28 = vrot.slane %v2181_v23, 7  ;;  %v2193_v37 = vsel %vm2138_vm13, %v659_v3, 0.0  ;;  %v730_v48 = vsel %vm209_vm0, %v714_v44, %v716_v41 }
 0x142   :  { %v2131_v61 = vsel %vm2097_vm11, %v661_v51, 0.0  ;;  %v662_v62 = vmax.f32 %v649_v52, 0.0  ;;  %v1488_v9 = vpack.c.bf16 %v661_v51, %v659_v3  ;;  %v742_v24 = vpack.c.bf16 %v704_v15, %v706_v20  ;;  %v1733_v52 = vld [vmem:[#allocation7 + $0x150] sm:$0xff]  }
 0x143   :  { %v697_v54 = vrot.slane %v2131_v61, 7  ;;  %v702_v27 = vsel %vm196_vm1, %v694_v1, %v696_v28  ;;  %v695_v42 = vrot.slane %v2193_v37, 7  ;;  %v732_v51 = vsel %vm209_vm0, %v712_v47, %v714_v44  ;;  %v1738_v1 = vld [vmem:[#allocation7 + $0x100] sm:$0xff]  }
 0x144   :  { %v2153_v5 = vsel %vm2097_vm11, %v662_v62, 0.0  ;;  %v1485_v6 = vpack.c.bf16 %v662_v62, %v660_v56  ;;  %v740_v55 = vpack.c.bf16 %v730_v48, %v732_v51  ;;  %v1737_v56 = vld [vmem:[#allocation7 + $0x140] sm:$0xff]   ;;  %v720_v62 = vrot.slane %v2181_v23, 1 }
 0x145   :  { %v698_v10 = vrot.slane %v2153_v5, 7  ;;  %v709_v11 = vsel %vm196_vm1, %v697_v54, %v687_v2  ;;  %v699_v46 = vsel %vm196_vm1, %v695_v42, %v697_v54  ;;  %v701_v49 = vsel %vm196_vm1, %v693_v22, %v695_v42 }
 0x146   :  { %1486 = vmatprep.mubr.msk.bf16.mxu0 %vm1484_vm14, %v1485_v6  ;;  %v735_v19 = vpack.c.bf16 %v707_v16, %v709_v11  ;;  %v747_v34 = vpack.c.bf16 %v699_v46, %v701_v49  ;;  %v715_v54 = vrot.slane %v2174_v18, 1  ;;  %v718_v3 = vrot.slane %v2109_v31, 1 }
 0x147   :  { %1489 = vmatmul.mubr.msk.bf16.gmra.mxu0 %vm1484_vm14, %v1488_v9  ;;  %v710_v14 = vsel %vm196_vm1, %v698_v10, %v688_v7  ;;  %v700_v32 = vsel %vm196_vm1, %v696_v28, %v698_v10  ;;  %v711_v2 = vrot.slane %v2115_v58, 1  ;;  %v719_v9 = vrot.slane %v2193_v37, 1 }
 0x148   :  { %v736_v0 = vpack.c.bf16 %v708_v13, %v710_v14  ;;  %v748_v40 = vpack.c.bf16 %v700_v32, %v702_v27  ;;  %v729_v4 = vsel %vm209_vm0, %v713_v63, %v715_v54  ;;  %v726_v6 = vsel %vm209_vm0, %v718_v3, %v720_v62  ;;  %v1423_v27 = vld [vmem:[%s2251_s4] ss:$0 sm:$0xff]  ;;  %s1857_s4 = smov [#allocation8]  }
 0x149   :  { %v731_v7 = vsel %vm209_vm0, %v711_v2, %v713_v63  ;;  %v728_v60 = vsel %vm209_vm0, %v716_v41, %v718_v3  ;;  %v722_v10 = vrot.slane %v2153_v5, 1  ;;  %v717_v58 = vrot.slane %v2162_v12, 1  ;;  %s1362_s12 = sshll.u32 %s1857_s4, 4  ;;  %s1363_s12 = int_to_ptr.vmem [resolvable:$true] %s1362_s12 }
 0x14a   :  { %1176 = vmatprep.mubr.bf16.mxu1 %v736_v0  ;;  %v739_v8 = vpack.c.bf16 %v729_v4, %v731_v7  ;;  %v746_v31 = vpack.c.bf16 %v726_v6, %v728_v60  ;;  %v721_v0 = vrot.slane %v2131_v61, 1  ;;  %s1823_s13 = scalar_lea.vmem %s1363_s12, 768  ;;  %p1828_p2 = scmp.lt.s32.totalorder %s1363_s12, %s1363_s12 }
 0x14b   :  { %1177 = vmatmul.mubr.bf16.vlgmr.msra.gmra.mxu1 %v735_v19  ;;  %v725_v11 = vsel %vm209_vm0, %v717_v58, %v719_v9  ;;  %v724_v13 = vsel %vm209_vm0, %v720_v62, %v722_v10  ;;  %v734_v14 = vsel %vm209_vm0, %v722_v10, %v712_v47  ;;  %v727_v15 = vsel %vm209_vm0, %v715_v54, %v717_v58  ;;  %p1824_p1 = scmp.ne.s32.totalorder %s1363_s12, %s1823_s13  ;;  %p1829_p3 = scmp.lt.s32.totalorder %s1823_s13, %s1823_s13 }
 0x14c   :  { %1565 = vmatpush3.bf16.msra.mxu1 %v1724_v17  ;;  %1184 = vmatprep.mubr.bf16.mxu1 %v742_v24  ;;  %v745_v16 = vpack.c.bf16 %v725_v11, %v727_v15  ;;  %v752_v5 = vpack.c.bf16 %v734_v14, %v724_v13  ;;  %v723_v12 = vsel %vm209_vm0, %v719_v9, %v721_v0 }
 0x14d   :  { %1566 = vmatprep.subr.bf16.mxu1 %v1725_v21  ;;  %v733_v17 = vsel %vm209_vm0, %v721_v0, %v711_v2  ;;  %p1830_p4 = por %p1829_p3, %p1828_p2 }
 0x14e   :  { %v751_v18 = vpack.c.bf16 %v733_v17, %v723_v12 }
 0x14f   :  { %p1831_p5 = pnand %p1830_p4, %p1824_p1 }
 0x150   :  { %1567 = vmatpush3.bf16.msra.mxu1 %v1726_v26 }
 0x151   :  { %1568 = vmatprep.subr.bf16.mxu1 %v1727_v29 }
 0x153   :  { %1185 = vmatmul.mubr.bf16.gmra.mxu1 %v741_v38 }
 0x154   :  { %1569 = vmatpush3.bf16.msra.mxu1 %v1728_v36  ;;  %1192 = vmatprep.mubr.bf16.mxu1 %v748_v40 }
 0x155   :  { %1570 = vmatprep.subr.bf16.mxu1 %v1729_v39 }
 0x158   :  { %1571 = vmatpush3.bf16.msra.mxu1 %v1730_v43 }
 0x159   :  { %1572 = vmatprep.subr.bf16.mxu1 %v1731_v45 }
 0x15b   :  { %1193 = vmatmul.mubr.bf16.gmra.mxu1 %v747_v34 }
 0x15c   :  { %1573 = vmatpush3.bf16.msra.mxu1 %v1732_v50  ;;  %1290 = vmatprep.mubr.bf16.mxu1 %v740_v55 }
 0x15d   :  { %1574 = vmatprep.subr.bf16.mxu1 %v1733_v52 }
 0x160   :  { %1575 = vmatpush3.bf16.msra.mxu1 %v1734_v57 }
 0x161   :  { %1576 = vmatprep.subr.bf16.mxu1 %v1735_v59 }
 0x164   :  { %1577 = vmatpush3.bf16.msra.mxu1 %v1736_v53 }
 0x165   :  { %1578 = vmatprep.subr.bf16.mxu1 %v1737_v56 }
 0x168   :  { %1579 = vmatpush3.bf16.msra.mxu1 %v1738_v1 }
 0x16b   :  { %1291 = vmatmul.mubr.bf16.vlgmr.msra.gmra.mxu1 %v739_v8 }
 0x16c   :  { %1298 = vmatprep.mubr.bf16.mxu1 %v746_v31 }
 0x173   :  { %1299 = vmatmul.mubr.bf16.gmra.mxu1 %v745_v16 }
 0x174   :  { %1306 = vmatprep.mubr.bf16.mxu1 %v752_v5 }
 0x17b   :  { %1307 = vmatmul.mubr.bf16.gmra.mxu1 %v751_v18 }
 0x1f7   :  { %v1546_v22 = vpop.f32.mrf.mxu0 }
 0x1f9   :  { %v1547_v25 = vpop.f32.mrf.mxu0 }
 0x1fa   :  { %v1548_v44 = vadd.f32 %v1547_v25, %v1546_v22 }
 0x1fb   :  { %v1549_v28 = vpop.f32.mrf.mxu0 }
 0x1fd   :  { %v1550_v30 = vpop.f32.mrf.mxu0 }
 0x1fe   :  { %v1551_v51 = vadd.f32 %v1550_v30, %v1549_v28 }
 0x1ff   :  { %v1552_v35 = vpop.f32.mrf.mxu0 }
 0x201   :  { %v1553_v37 = vpop.f32.mrf.mxu0 }
 0x202   :  { %v1554_v1 = vadd.f32 %v1553_v37, %v1552_v35 }
 0x203   :  { %v1555_v39 = vpop.f32.mrf.mxu0 }
 0x205   :  { %v1556_v45 = vpop.f32.mrf.mxu0 }
 0x206   :  { %v1557_v31 = vadd.f32 %v1556_v45, %v1555_v39 }
 0x207   :  { %v1558_v55 = vpop.f32.mrf.mxu0 }
 0x209   :  { %v1559_v2 = vpop.f32.mrf.mxu0 }
 0x20a   :  { %v1560_v17 = vadd.f32 %v1559_v2, %v1558_v55 }
 0x20b   :  { %v1512_v19 = vpop.f32.mrf.mxu1  ;;  %v1561_v11 = vpop.f32.mrf.mxu0 }
 0x20d   :  { %v1513_v20 = vpop.f32.mrf.mxu1 }
 0x20e   :  { %v1514_v38 = vadd.f32 %v1513_v20, %v1512_v19  ;;  %v1562_v19 = vpop.f32.mrf.mxu0 }
 0x20f   :  { %v1515_v21 = vpop.f32.mrf.mxu1 }
 0x210   :  { %v1179_v41 = vadd.f32 %v1514_v38, %v1423_v27 }
 0x211   :  { %v1516_v23 = vpop.f32.mrf.mxu1 }
 0x212   :  { %v1517_v42 = vadd.f32 %v1516_v23, %v1515_v21  ;;  %v1236_v49 = vadd.f32 %v1548_v44, %v1179_v41 }
 0x213   :  { %v1518_v24 = vpop.f32.mrf.mxu1 }
 0x214   :  { %v1182_v47 = vadd.f32 %v1517_v42, %v1423_v27 }
 0x215   :  { %v1519_v26 = vpop.f32.mrf.mxu1 }
 0x216   :  { %v1520_v48 = vadd.f32 %v1519_v26, %v1518_v24  ;;  %v1239_v54 = vadd.f32 %v1551_v51, %v1182_v47  ;;  %v1563_v26 = vadd.f32 %v1562_v19, %v1561_v11 }
 0x217   :  { %v1521_v61 = vpop.f32.mrf.mxu1 }
 0x218   :  { %v1187_v53 = vadd.f32 %v1520_v48, %v1423_v27 }
 0x219   :  { %v1522_v29 = vpop.f32.mrf.mxu1 }
 0x21a   :  { %v1523_v57 = vadd.f32 %v1522_v29, %v1521_v61  ;;  %v1244_v60 = vadd.f32 %v1554_v1, %v1187_v53 }
 0x21b   :  { %v1524_v32 = vpop.f32.mrf.mxu1 }
 0x21c   :  { %v1190_v4 = vadd.f32 %v1523_v57, %v1423_v27 }
 0x21d   :  { %v1525_v36 = vpop.f32.mrf.mxu1 }
 0x21e   :  { %v1526_v7 = vadd.f32 %v1525_v36, %v1524_v32  ;;  %v1247_v13 = vadd.f32 %v1557_v31, %v1190_v4 }
 0x21f   :  { %v1527_v33 = vpop.f32.mrf.mxu1 }
 0x220   :  { %v1195_v15 = vadd.f32 %v1526_v7, %v1423_v27 }
 0x221   :  { %v1528_v40 = vpop.f32.mrf.mxu1 }
 0x222   :  { %v1529_v16 = vadd.f32 %v1528_v40, %v1527_v33  ;;  %v1252_v23 = vadd.f32 %v1560_v17, %v1195_v15 }
 0x224   :  { %v1198_v21 = vadd.f32 %v1529_v16, %v1423_v27 }
 0x226   :  { %v1255_v35 = vadd.f32 %v1563_v26, %v1198_v21 }
 0x22b   :  { %v1580_v43 = vpop.f32.mrf.mxu1 }
 0x22d   :  { %v1581_v46 = vpop.f32.mrf.mxu1 }
 0x22e   :  { %v1582_v50 = vadd.f32 %v1581_v46, %v1580_v43 }
 0x22f   :  { %v1583_v34 = vpop.f32.mrf.mxu1 }
 0x230   :  { %v1293_v52 = vadd.f32 %v1582_v50, %v1236_v49 }
 0x231   :  { %v1584_v59 = vpop.f32.mrf.mxu1 }
 0x232   :  { %v1490_v56 = vmul.f32 -1.442695, %v1293_v52  ;;  %v1585_v62 = vadd.f32 %v1584_v59, %v1583_v34 }
 0x233   :  { %v1586_v63 = vpop.f32.mrf.mxu1 }
 0x234   :  { %1739 = vpow2.f32 %v1490_v56  ;;  %v1296_v3 = vadd.f32 %v1585_v62, %v1239_v54 }
 0x235   :  { %v1587_v6 = vpop.f32.mrf.mxu1 }
 0x236   :  { %v1491_v8 = vmul.f32 -1.442695, %v1296_v3  ;;  %v1588_v9 = vadd.f32 %v1587_v6, %v1586_v63 }
 0x237   :  { %v1589_v10 = vpop.f32.mrf.mxu1 }
 0x238   :  { %1741 = vpow2.f32 %v1491_v8  ;;  %v1301_v58 = vadd.f32 %v1588_v9, %v1244_v60 }
 0x239   :  { %v1590_v14 = vpop.f32.mrf.mxu1 }
 0x23a   :  { %v1492_v0 = vmul.f32 -1.442695, %v1301_v58  ;;  %v1591_v5 = vadd.f32 %v1590_v14, %v1589_v10 }
 0x23b   :  { %v1592_v12 = vpop.f32.mrf.mxu1 }
 0x23c   :  { %1743 = vpow2.f32 %v1492_v0  ;;  %v1304_v18 = vadd.f32 %v1591_v5, %v1247_v13 }
 0x23d   :  { %v1593_v20 = vpop.f32.mrf.mxu1 }
 0x23e   :  { %v1493_v22 = vmul.f32 -1.442695, %v1304_v18  ;;  %v1594_v24 = vadd.f32 %v1593_v20, %v1592_v12 }
 0x23f   :  { %v1595_v25 = vpop.f32.mrf.mxu1 }
 0x240   :  { %1745 = vpow2.f32 %v1493_v22  ;;  %v1309_v61 = vadd.f32 %v1594_v24, %v1252_v23 }
 0x241   :  { %v1740_v28 = vpop.eup %1739  ;;  %v1596_v29 = vpop.f32.mrf.mxu1 }
 0x242   :  { %v1333_v30 = vadd.f32 1.0, %v1740_v28  ;;  %v1494_v32 = vmul.f32 -1.442695, %v1309_v61  ;;  %v1597_v36 = vadd.f32 %v1596_v29, %v1595_v25 }
 0x244   :  { %1747 = vrcp.f32 %v1333_v30  ;;  %v1312_v37 = vadd.f32 %v1597_v36, %v1255_v35 }
 0x245   :  { %v1742_v33 = vpop.eup %1741  ;;  %1749 = vpow2.f32 %v1494_v32 }
 0x246   :  { %v1334_v38 = vadd.f32 1.0, %v1742_v33  ;;  %v1495_v39 = vmul.f32 -1.442695, %v1312_v37 }
 0x248   :  { %1751 = vrcp.f32 %v1334_v38 }
 0x249   :  { %v1744_v27 = vpop.eup %1743  ;;  %1753 = vpow2.f32 %v1495_v39 }
 0x24a   :  { %v1335_v40 = vadd.f32 1.0, %v1744_v27 }
 0x24c   :  { %1755 = vrcp.f32 %v1335_v40 }
 0x24d   :  { %v1746_v41 = vpop.eup %1745 }
 0x24e   :  { %v1336_v42 = vadd.f32 1.0, %v1746_v41 }
 0x250   :  { %1757 = vrcp.f32 %v1336_v42 }
 0x251   :  { %v1748_v43 = vpop.eup %1747 }
 0x252   :  { %v1750_v44 = vpop.eup %1749  ;;  %1351 = vst [vmem:[#allocation8] sm:$0xff] %v1748_v43 }
 0x253   :  { %v1337_v45 = vadd.f32 1.0, %v1750_v44 }
 0x255   :  { %v1752_v46 = vpop.eup %1751  ;;  %1759 = vrcp.f32 %v1337_v45 }
 0x256   :  { %v1754_v47 = vpop.eup %1753  ;;  %1352 = vst [vmem:[#allocation8 + $0x8] sm:$0xff] %v1752_v46 }
 0x257   :  { %v1338_v48 = vadd.f32 1.0, %v1754_v47 }
 0x259   :  { %v1756_v49 = vpop.eup %1755  ;;  %1761 = vrcp.f32 %v1338_v48 }
 0x25a   :  { %1353 = vst [vmem:[#allocation8 + $0x10] sm:$0xff] %v1756_v49 }
 0x25d   :  { %v1758_v50 = vpop.eup %1757 }
 0x25e   :  { %1354 = vst [vmem:[#allocation8 + $0x18] sm:$0xff] %v1758_v50 }
 0x262   :  { %v1760_v34 = vpop.eup %1759 }
 0x263   :  { %1355 = vst [vmem:[#allocation8 + $0x20] sm:$0xff] %v1760_v34 }
 0x266   :  { %v1762_v51 = vpop.eup %1761 }
 0x267   :  { %1356 = vst [vmem:[#allocation8 + $0x28] sm:$0xff] %v1762_v51 }
 0x268   :  { %1834 = shalt.err (!%p1831_p5)
}
 0x269   :  { %1368 = dma.vmem_to_hbm [thread:$0]  %s1363_s12, 768, %s2252_s5, [#allocation4], %s1851_s23, %s1851_s23, %s1852_s24  }
 0x26a   :  { %1847 = dma.done.wait [#allocation4], 768  }
 0x26b   :  { %1848 = vsyncadd [#allocation4], 4294966528 }
 0x26c   :  { %1372 = vsyncpa [#allocation3], 1 }
 0x26d   :  { %1373 = vsyncpa [#allocation6], 1 }
 0x26e   :  { %1374 = vsyncpa [#allocation4], 1 }

</bundles_post_ra>
